<compile_context>
chip_gen: v5e
topology: v5e:2x2
jax: 0.10.0
libtpu: 0.0.40
codegen_flags: <defaults>
</compile_context>

<pallas_src>
import jax
import jax.numpy as jnp
from jax.experimental import pallas as pl
from jax.experimental.pallas import tpu as pltpu


def _round_up(x, m):
    return (x + m - 1) // m * m


def ffn_kernel(x_ref, w1_ref, b1_ref, w2_ref, b2_ref, o_ref, acc_ref):
    # x_ref:  (tm, C)      w1_ref: (C, th)   b1_ref: (1, th)
    # w2_ref: (th, C)      b2_ref: (1, C)    o_ref:  (tm, C)
    # acc_ref: (tm, C) f32 scratch accumulator (persists across the H axis)
    h_idx = pl.program_id(1)

    @pl.when(h_idx == 0)
    def _():
        acc_ref[...] = jnp.zeros_like(acc_ref)

    x = x_ref[...]
    # First matmul + bias + ReLU on this H-slice (exact: ReLU is elementwise).
    h = jnp.dot(x, w1_ref[...], preferred_element_type=jnp.float32) + b1_ref[...]
    h = jnp.maximum(h, 0.0)
    # Feed the second MXU pass in the weight dtype (bf16 weights -> bf16 h).
    h = h.astype(w2_ref.dtype)
    acc_ref[...] += jnp.dot(h, w2_ref[...], preferred_element_type=jnp.float32)

    @pl.when(h_idx == pl.num_programs(1) - 1)
    def _():
        o_ref[...] = (acc_ref[...] + b2_ref[...]).astype(o_ref.dtype)


def feed_forward(x, w1, b1, w2, b2, *, compute_dtype=jnp.bfloat16):
    """x: (B, T, C). w1: (C, 4C), b1: (4C,), w2: (4C, C), b2: (C,)."""
    B, T, C = x.shape
    H = w1.shape[1]
    M = B * T
    out_dtype = x.dtype

    # --- dtype: run the MXU in bf16 (f32 accumulation inside the kernel) ----
    cdt = jnp.dtype(compute_dtype)
    x2d = x.reshape(M, C).astype(cdt)
    w1c = w1.astype(cdt)
    w2c = w2.astype(cdt)
    b1f = b1.astype(jnp.float32)
    b2f = b2.astype(jnp.float32)

    # --- pad C / H to lane-dense multiples of 128 (math stays exact) --------
    C_pad = _round_up(C, 128)
    H_pad = _round_up(H, 128)
    if C_pad != C:
        x2d = jnp.pad(x2d, ((0, 0), (0, C_pad - C)))
        w1c = jnp.pad(w1c, ((0, C_pad - C), (0, 0)))
        w2c = jnp.pad(w2c, ((0, 0), (0, C_pad - C)))
        b2f = jnp.pad(b2f, (0, C_pad - C))
    if H_pad != H:
        w1c = jnp.pad(w1c, ((0, 0), (0, H_pad - H)))
        b1f = jnp.pad(b1f, (0, H_pad - H))
        w2c = jnp.pad(w2c, ((0, H_pad - H), (0, 0)))
    b1_2d = b1f.reshape(1, H_pad)
    b2_2d = b2f.reshape(1, C_pad)

    # --- VMEM-driven tile sizing (adapts to v5e/v6e 128 MiB vs v7x 64 MiB) ---
    try:
        vmem_capacity = int(pltpu.get_tpu_info().vmem_capacity_bytes)
    except Exception:
        vmem_capacity = 64 * 1024 * 1024  # conservative fallback (v7x-sized)
    vmem_limit = max(32 * 1024 * 1024, int(vmem_capacity * 0.8))
    tile_budget = int(vmem_capacity * 0.7)  # headroom below the scoped limit

    cb = cdt.itemsize
    ob = jnp.dtype(out_dtype).itemsize

    def vmem_need(tm, th):
        return (2 * tm * C_pad * cb          # x tile (double-buffered)
                + 2 * C_pad * th * cb        # W1 H-slice (double-buffered)
                + 2 * th * C_pad * cb        # W2 H-slice (double-buffered)
                + 2 * tm * C_pad * ob        # output tile (double-buffered)
                + tm * C_pad * 4             # f32 accumulator scratch
                + 2 * (th + C_pad) * 4)      # biases

    # tile_m candidates (multiples of 128, largest first).  When M is already
    # a multiple of 128, restrict to divisors of M so no wrapper-side padding
    # (and its extra HBM pass) is needed.
    if M % 128 == 0:
        tm_opts = [t for t in range(min(1024, M), 127, -128) if M % t == 0]
    else:
        tm_opts = list(range(min(1024, max(128, _round_up(M, 128))), 127, -128))
    # tile_h candidates: multiples of 128 that divide H_pad, capped at 2048.
    th_opts = [t for t in range(H_pad, 0, -128) if H_pad % t == 0 and t <= 2048]

    tile_m, tile_h = tm_opts[-1], th_opts[-1]
    found = False
    for tm in tm_opts:            # prefer large M tiles: cuts W1/W2 re-streaming
        for th in th_opts:        # then the biggest H slice that still fits
            if vmem_need(tm, th) <= tile_budget:
                tile_m, tile_h = tm, th
                found = True
                break
        if found:
            break

    M_pad = _round_up(M, tile_m)
    if M_pad != M:
        x2d = jnp.pad(x2d, ((0, M_pad - M), (0, 0)))

    num_m = M_pad // tile_m
    num_h = H_pad // tile_h

    cost = pl.CostEstimate(
        flops=4 * M_pad * C_pad * H_pad,
        transcendentals=0,
        bytes_accessed=(
            M_pad * C_pad * (cb + ob)              # x in + out
            + num_m * 2 * C_pad * H_pad * cb       # streamed W1 + W2 per M tile
            + (H_pad + C_pad) * 4                  # biases
        ),
    )

    out2d = pl.pallas_call(
        ffn_kernel,
        out_shape=jax.ShapeDtypeStruct((M_pad, C_pad), out_dtype),
        grid_spec=pltpu.PrefetchScalarGridSpec(
            num_scalar_prefetch=0,
            grid=(num_m, num_h),
            in_specs=[
                pl.BlockSpec((tile_m, C_pad), lambda i, h: (i, 0)),   # x tile
                pl.BlockSpec((C_pad, tile_h), lambda i, h: (0, h)),   # W1 H-slice
                pl.BlockSpec((1, tile_h), lambda i, h: (0, h)),       # b1 H-slice
                pl.BlockSpec((tile_h, C_pad), lambda i, h: (h, 0)),   # W2 H-slice
                pl.BlockSpec((1, C_pad), lambda i, h: (0, 0)),        # b2
            ],
            out_specs=pl.BlockSpec((tile_m, C_pad), lambda i, h: (i, 0)),
            scratch_shapes=[pltpu.VMEM((tile_m, C_pad), jnp.float32)],
        ),
        compiler_params=pltpu.CompilerParams(
            dimension_semantics=("parallel", "arbitrary"),
            vmem_limit_bytes=vmem_limit,
        ),
        cost_estimate=cost,
    )(x2d, w1c, b1_2d, w2c, b2_2d)

    if M_pad != M:
        out2d = out2d[:M]
    if C_pad != C:
        out2d = out2d[:, :C]
    return out2d.reshape(B, T, C)


def init_params(key, n_embd):
    """Deterministic init matching nn.Linear shapes (uniform(-k, k), k=1/sqrt(fan_in))."""
    hidden = 4 * n_embd
    k1, k2, k3, k4 = jax.random.split(key, 4)
    bound1 = 1.0 / jnp.sqrt(n_embd)
    bound2 = 1.0 / jnp.sqrt(hidden)
    w1 = jax.random.uniform(k1, (n_embd, hidden), jnp.float32, -bound1, bound1)
    b1 = jax.random.uniform(k2, (hidden,), jnp.float32, -bound1, bound1)
    w2 = jax.random.uniform(k3, (hidden, n_embd), jnp.float32, -bound2, bound2)
    b2 = jax.random.uniform(k4, (n_embd,), jnp.float32, -bound2, bound2)
    return w1, b1, w2, b2


if __name__ == "__main__":
    B, T, n_embd = 2, 8, 32
    dropout = 0.1  # inference mode -> identity

    key = jax.random.PRNGKey(0)
    kx, kp = jax.random.split(key)
    x = jax.random.normal(kx, (B, T, n_embd), jnp.float32)
    w1, b1, w2, b2 = init_params(kp, n_embd)

    out = feed_forward(x, w1, b1, w2, b2)
    out = jax.block_until_ready(out)

    # Reference mirroring the kernel's arithmetic (bf16 MXU operands, f32 accum,
    # f32 bias adds, bf16 intermediate activation).
    xb = x.reshape(-1, n_embd).astype(jnp.bfloat16)
    h = jnp.dot(xb, w1.astype(jnp.bfloat16), preferred_element_type=jnp.float32) + b1
    h = jnp.maximum(h, 0.0).astype(jnp.bfloat16)
    ref = jnp.dot(h, w2.astype(jnp.bfloat16), preferred_element_type=jnp.float32) + b2
    ref = ref.reshape(B, T, n_embd).astype(x.dtype)

    assert out.shape == (B, T, n_embd)
    assert jnp.allclose(out, ref, atol=2e-2, rtol=2e-2)

    print("KERNEL_OK")
</pallas_src>

<mosaic_0001>
module attributes {stable_mosaic.version = 11 : i64} {
  func.func @ffn_kernel(%arg0: i32, %arg1: i32, %arg2: memref<128x128xbf16, #tpu.memory_space<vmem>>, %arg3: memref<128x128xbf16, #tpu.memory_space<vmem>>, %arg4: memref<1x128xf32, #tpu.memory_space<vmem>>, %arg5: memref<128x128xbf16, #tpu.memory_space<vmem>>, %arg6: memref<1x128xf32, #tpu.memory_space<vmem>>, %arg7: memref<128x128xf32, #tpu.memory_space<vmem>>, %arg8: memref<128x128xf32, #tpu.memory_space<vmem>>) attributes {dimension_semantics = [#tpu.dimension_semantics<parallel>, #tpu.dimension_semantics<arbitrary>], iteration_bounds = array<i64: 1, 1>, scalar_prefetch = 0 : i64, scratch_operands = 1 : i64, tpu.core_type = #tpu.core_type<tc>, window_params = [{transform_indices = @transform_0, window_bounds = array<i64: 128, 128>}, {transform_indices = @transform_1, window_bounds = array<i64: 128, 128>}, {transform_indices = @transform_2, window_bounds = array<i64: 1, 128>}, {transform_indices = @transform_3, window_bounds = array<i64: 128, 128>}, {pipeline_mode = #tpu.pipeline_mode<synchronous>, transform_indices = @transform_4, window_bounds = array<i64: 1, 128>}, {transform_indices = @transform_5, window_bounds = array<i64: 128, 128>}]} {
    %c0_i32 = arith.constant 0 : i32
    %0 = arith.cmpi eq, %arg1, %c0_i32 : i32
    %1 = arith.extui %0 : i1 to i32
    %c0_i32_0 = arith.constant 0 : i32
    %2 = arith.cmpi ne, %1, %c0_i32_0 : i32
    scf.if %2 {
      %cst_16 = arith.constant 0.000000e+00 : f32
      %20 = vector.broadcast %cst_16 : f32 to vector<128x128xf32>
      %c0_17 = arith.constant 0 : index
      %c0_18 = arith.constant 0 : index
      %21 = vector.load %arg8[%c0_17, %c0_18] : memref<128x128xf32, #tpu.memory_space<vmem>>, vector<128x128xf32>
      tpu.vector_store %arg8[%c0_17, %c0_18], %20 {strides = array<i32>} : memref<128x128xf32, #tpu.memory_space<vmem>>, vector<128x128xf32>,
    } else {
    }
    %c0 = arith.constant 0 : index
    %c0_1 = arith.constant 0 : index
    %3 = vector.load %arg2[%c0, %c0_1] : memref<128x128xbf16, #tpu.memory_space<vmem>>, vector<128x128xbf16>
    %c0_2 = arith.constant 0 : index
    %c0_3 = arith.constant 0 : index
    %4 = vector.load %arg3[%c0_2, %c0_3] : memref<128x128xbf16, #tpu.memory_space<vmem>>, vector<128x128xbf16>
    %cst = arith.constant dense<0.000000e+00> : vector<128x128xf32>
    %5 = tpu.matmul %3, %4, %cst {dimension_numbers = #tpu.dot_dimension_numbers<[1], [0], [0], [1], [0, 0, 1, 1], [], []>} : vector<128x128xbf16>, vector<128x128xbf16>, vector<128x128xf32> -> vector<128x128xf32>
    %c0_4 = arith.constant 0 : index
    %c0_5 = arith.constant 0 : index
    %6 = vector.load %arg4[%c0_4, %c0_5] : memref<1x128xf32, #tpu.memory_space<vmem>>, vector<1x128xf32>
    %7 = vector.broadcast %6 : vector<1x128xf32> to vector<128x128xf32>
    %8 = arith.addf %5, %7 : vector<128x128xf32>
    %cst_6 = arith.constant 0.000000e+00 : f32
    %9 = vector.broadcast %cst_6 : f32 to vector<128x128xf32>
    %10 = arith.maximumf %8, %9 : vector<128x128xf32>
    %11 = arith.truncf %10 : vector<128x128xf32> to vector<128x128xbf16>
    %c0_7 = arith.constant 0 : index
    %c0_8 = arith.constant 0 : index
    %12 = vector.load %arg8[%c0_7, %c0_8] : memref<128x128xf32, #tpu.memory_space<vmem>>, vector<128x128xf32>
    %c0_9 = arith.constant 0 : index
    %c0_10 = arith.constant 0 : index
    %13 = vector.load %arg5[%c0_9, %c0_10] : memref<128x128xbf16, #tpu.memory_space<vmem>>, vector<128x128xbf16>
    %cst_11 = arith.constant dense<0.000000e+00> : vector<128x128xf32>
    %14 = tpu.matmul %11, %13, %cst_11 {dimension_numbers = #tpu.dot_dimension_numbers<[1], [0], [0], [1], [0, 0, 1, 1], [], []>} : vector<128x128xbf16>, vector<128x128xbf16>, vector<128x128xf32> -> vector<128x128xf32>
    %15 = arith.addf %12, %14 : vector<128x128xf32>
    %c0_12 = arith.constant 0 : index
    %c0_13 = arith.constant 0 : index
    %16 = vector.load %arg8[%c0_12, %c0_13] : memref<128x128xf32, #tpu.memory_space<vmem>>, vector<128x128xf32>
    tpu.vector_store %arg8[%c0_12, %c0_13], %15 {strides = array<i32>} : memref<128x128xf32, #tpu.memory_space<vmem>>, vector<128x128xf32>,
    %c0_i32_14 = arith.constant 0 : i32
    %17 = arith.cmpi eq, %arg1, %c0_i32_14 : i32
    %18 = arith.extui %17 : i1 to i32
    %c0_i32_15 = arith.constant 0 : i32
    %19 = arith.cmpi ne, %18, %c0_i32_15 : i32
    scf.if %19 {
      %c0_16 = arith.constant 0 : index
      %c0_17 = arith.constant 0 : index
      %20 = vector.load %arg8[%c0_16, %c0_17] : memref<128x128xf32, #tpu.memory_space<vmem>>, vector<128x128xf32>
      %c0_18 = arith.constant 0 : index
      %c0_19 = arith.constant 0 : index
      %21 = vector.load %arg6[%c0_18, %c0_19] : memref<1x128xf32, #tpu.memory_space<vmem>>, vector<1x128xf32>
      %22 = vector.broadcast %21 : vector<1x128xf32> to vector<128x128xf32>
      %23 = arith.addf %20, %22 : vector<128x128xf32>
      %c0_20 = arith.constant 0 : index
      %c0_21 = arith.constant 0 : index
      %24 = vector.load %arg7[%c0_20, %c0_21] : memref<128x128xf32, #tpu.memory_space<vmem>>, vector<128x128xf32>
      tpu.vector_store %arg7[%c0_20, %c0_21], %23 {strides = array<i32>} : memref<128x128xf32, #tpu.memory_space<vmem>>, vector<128x128xf32>,
    } else {
    }
    return
  }
  func.func @transform_0(%arg0: i32, %arg1: i32) -> (i32, i32) {
    %c0_i32 = arith.constant 0 : i32
    %c0_i32_0 = arith.constant 0 : i32
    return %arg0, %c0_i32 : i32, i32
  }
  func.func @transform_1(%arg0: i32, %arg1: i32) -> (i32, i32) {
    %c0_i32 = arith.constant 0 : i32
    %c0_i32_0 = arith.constant 0 : i32
    return %c0_i32, %arg1 : i32, i32
  }
  func.func @transform_2(%arg0: i32, %arg1: i32) -> (i32, i32) {
    %c0_i32 = arith.constant 0 : i32
    %c0_i32_0 = arith.constant 0 : i32
    return %c0_i32, %arg1 : i32, i32
  }
  func.func @transform_3(%arg0: i32, %arg1: i32) -> (i32, i32) {
    %c0_i32 = arith.constant 0 : i32
    %c0_i32_0 = arith.constant 0 : i32
    return %arg1, %c0_i32 : i32, i32
  }
  func.func @transform_4(%arg0: i32, %arg1: i32) -> (i32, i32) {
    %c0_i32 = arith.constant 0 : i32
    %c0_i32_0 = arith.constant 0 : i32
    %c0_i32_1 = arith.constant 0 : i32
    return %c0_i32, %c0_i32_0 : i32, i32
  }
  func.func @transform_5(%arg0: i32, %arg1: i32) -> (i32, i32) {
    %c0_i32 = arith.constant 0 : i32
    %c0_i32_0 = arith.constant 0 : i32
    return %arg0, %c0_i32 : i32, i32
  }
}

</mosaic_0001>

<bundles_post_ra>
// kernel: tpu_custom_call.1
= control target key start
LH: loop header
LB: loop body
LE: loop exit
PB: predicated region body
PF: predicated region fallthrough
CT: control target
= control target key end

     0   :  { %10 = vsyncpa [#allocation4], 0  ;;  %s833_s0 = inlined_call_operand.hbm [shape: bf16[128,128], index: 0, kind: input, shape index: {}]   ;;  %s834_s1 = inlined_call_operand.hbm [shape: bf16[128,128], index: 1, kind: input, shape index: {}]   ;;  %s835_s2 = inlined_call_operand.vmem [shape: f32[1,128], index: 2, kind: input, shape index: {}]   ;;  %s836_s3 = inlined_call_operand.hbm [shape: bf16[128,128], index: 3, kind: input, shape index: {}]   ;;  %s837_s4 = inlined_call_operand.vmem [shape: f32[1,128], index: 4, kind: input, shape index: {}]   ;;  %s838_s5 = inlined_call_operand.hbm [shape: f32[128,128], index: 5, kind: output, shape index: {}]  }
   0x1   :  { %11 = vsyncpa [#allocation7], 0 }
   0x2   :  { %12 = vsyncpa [#allocation5], 0  ;;  %s30_s20 = sshll.u32 %s834_s1, 4  ;;  %s777_s21 = smov [#allocation6]   ;;  %s31_s20 = int_to_ptr.hbm [resolvable:$true] %s30_s20 }
   0x3   :  { %s32_s22 = sshll.u32 %s777_s21, 4  ;;  %s17_s25 = sshll.u32 %s833_s0, 4  ;;  %s33_s22 = int_to_ptr.vmem [resolvable:$true] %s32_s22  ;;  %s18_s25 = int_to_ptr.hbm [resolvable:$true] %s17_s25 }
   0x4   :  { %s778_s26 = smov 64   ;;  %s779_s27 = smov 4  }
   0x5   :  { %38 = dma.hbm_to_vmem [thread:$0]  %s31_s20, 1024, %s33_s22, [#allocation7], %s778_s26, %s778_s26, %s779_s27  }
   0x6   :  { %s780_s28 = smov [#allocation3]   ;;  %s45_s7 = sshll.u32 %s836_s3, 4  ;;  %s46_s7 = int_to_ptr.hbm [resolvable:$true] %s45_s7 }
   0x7   :  { %s19_s29 = sshll.u32 %s780_s28, 4  ;;  %s781_s1 = smov [#allocation8]   ;;  %s20_s29 = int_to_ptr.vmem [resolvable:$true] %s19_s29 }
   0x8   :  { %25 = dma.hbm_to_vmem [thread:$0]  %s18_s25, 1024, %s20_s29, [#allocation4], %s778_s26, %s778_s26, %s779_s27  }
   0x9   :  { %s47_s8 = sshll.u32 %s781_s1, 4  ;;  %s48_s8 = int_to_ptr.vmem [resolvable:$true] %s47_s8 }
   0xa   :  { %53 = dma.hbm_to_vmem [thread:$0]  %s46_s7, 1024, %s48_s8, [#allocation7], %s778_s26, %s778_s26, %s779_s27  }
   0xb   :  { %771 = dma.done.wait [#allocation4], 1024  }
   0xc   :  { %772 = vsyncadd [#allocation4], 4294966272 }
   0xd   :  { %773 = dma.done.wait [#allocation7], 2048  }
   0xe   :  { %774 = vsyncadd [#allocation7], 4294965248  ;;  %v640_v0 = vld [vmem:[#allocation6 + $0x38] sm:$0xff]  ;;  %v639_v1 = vld [vmem:[#allocation6 + $0x30] sm:$0xff]  ;;  %s515_s13 = sshll.u32 %s838_s5, 4  ;;  %s783_s14 = smov 128   ;;  %s516_s13 = int_to_ptr.hbm [resolvable:$true] %s515_s13 }
   0xf   :  { %220 = vmatpush.bf16.msra.mxu0 %v640_v0  ;;  %649 = vmatpush.bf16.msra.mxu2 %v640_v0  ;;  %v638_v2 = vld [vmem:[#allocation6 + $0x28] sm:$0xff]  ;;  %v637_v3 = vld [vmem:[#allocation6 + $0x20] sm:$0xff]  ;;  %v636_v4 = vld [vmem:[#allocation6 + $0x18] sm:$0xff]  ;;  %s784_s15 = smov 8  }
  0x10   :  { %v635_v5 = vld [vmem:[#allocation6 + $0x10] sm:$0xff]  ;;  %v634_v6 = vld [vmem:[#allocation6 + $0x8] sm:$0xff]  ;;  %v633_v7 = vld [vmem:[#allocation6] sm:$0xff] }
  0x11   :  { %v625_v8 = vld [vmem:[#allocation3] sm:$0xff]  ;;  %v626_v10 = vld [vmem:[#allocation3 + $0x8] sm:$0xff]  ;;  %v648_v12 = vld [vmem:[#allocation8 + $0x38] sm:$0xff] }
  0x12   :  { %v629_v9 = vld [vmem:[#allocation3 + $0x20] sm:$0xff]  ;;  %v630_v11 = vld [vmem:[#allocation3 + $0x28] sm:$0xff]  ;;  %373 = vmatpush.bf16.msra.mxu1 %v648_v12  ;;  %v647_v13 = vld [vmem:[#allocation8 + $0x30] sm:$0xff]  ;;  %657 = vmatpush.bf16.msra.mxu3 %v648_v12 }
  0x13   :  { %221 = vmatpush.bf16.msra.mxu0 %v639_v1  ;;  %650 = vmatpush.bf16.msra.mxu2 %v639_v1  ;;  %v646_v14 = vld [vmem:[#allocation8 + $0x28] sm:$0xff]  ;;  %v645_v15 = vld [vmem:[#allocation8 + $0x20] sm:$0xff]  ;;  %v627_v16 = vld [vmem:[#allocation3 + $0x10] sm:$0xff] }
  0x14   :  { %v631_v17 = vld [vmem:[#allocation3 + $0x30] sm:$0xff]  ;;  %v628_v18 = vld [vmem:[#allocation3 + $0x18] sm:$0xff]  ;;  %v642_v22 = vld [vmem:[#allocation8 + $0x8] sm:$0xff] }
  0x15   :  { %v632_v19 = vld [vmem:[#allocation3 + $0x38] sm:$0xff]  ;;  %v643_v21 = vld [vmem:[#allocation8 + $0x10] sm:$0xff]  ;;  %v641_v23 = vld [vmem:[#allocation8] sm:$0xff] }
  0x16   :  { %374 = vmatpush.bf16.msra.mxu1 %v647_v13  ;;  %658 = vmatpush.bf16.msra.mxu3 %v647_v13  ;;  %v644_v20 = vld [vmem:[#allocation8 + $0x18] sm:$0xff]  ;;  %v673_v25 = vld [vmem:[%s835_s2] ss:$0 sm:$0xff] }
  0x17   :  { %222 = vmatpush.bf16.msra.mxu0 %v638_v2  ;;  %651 = vmatpush.bf16.msra.mxu2 %v638_v2 }
  0x1a   :  { %375 = vmatpush.bf16.msra.mxu1 %v646_v14  ;;  %659 = vmatpush.bf16.msra.mxu3 %v646_v14 }
  0x1b   :  { %223 = vmatpush.bf16.msra.mxu0 %v637_v3  ;;  %652 = vmatpush.bf16.msra.mxu2 %v637_v3 }
  0x1e   :  { %376 = vmatpush.bf16.msra.mxu1 %v645_v15  ;;  %660 = vmatpush.bf16.msra.mxu3 %v645_v15 }
  0x1f   :  { %224 = vmatpush.bf16.msra.mxu0 %v636_v4  ;;  %653 = vmatpush.bf16.msra.mxu2 %v636_v4 }
  0x22   :  { %377 = vmatpush.bf16.msra.mxu1 %v644_v20  ;;  %661 = vmatpush.bf16.msra.mxu3 %v644_v20 }
  0x23   :  { %225 = vmatpush.bf16.msra.mxu0 %v635_v5  ;;  %654 = vmatpush.bf16.msra.mxu2 %v635_v5 }
  0x26   :  { %378 = vmatpush.bf16.msra.mxu1 %v643_v21  ;;  %662 = vmatpush.bf16.msra.mxu3 %v643_v21 }
  0x27   :  { %226 = vmatpush.bf16.msra.mxu0 %v634_v6  ;;  %655 = vmatpush.bf16.msra.mxu2 %v634_v6 }
  0x2a   :  { %379 = vmatpush.bf16.msra.mxu1 %v642_v22  ;;  %663 = vmatpush.bf16.msra.mxu3 %v642_v22 }
  0x2b   :  { %227 = vmatpush.bf16.msra.mxu0 %v633_v7  ;;  %656 = vmatpush.bf16.msra.mxu2 %v633_v7 }
  0x2e   :  { %228 = vmatmul.bf16.vlgmr.msra.gmra.mxu0 %v625_v8  ;;  %248 = vmatmul.bf16.vlgmr.msra.gmra.mxu2 %v629_v9 }
  0x2f   :  { %380 = vmatpush.bf16.msra.mxu1 %v641_v23  ;;  %664 = vmatpush.bf16.msra.mxu3 %v641_v23 }
  0x3e   :  { %233 = vmatmul.bf16.gmra.mxu0 %v626_v10  ;;  %253 = vmatmul.bf16.gmra.mxu2 %v630_v11 }
  0x4e   :  { %238 = vmatmul.bf16.gmra.mxu0 %v627_v16  ;;  %258 = vmatmul.bf16.gmra.mxu2 %v631_v17  ;;  %v674_v17 = vld [vmem:[%s837_s4] ss:$0 sm:$0xff]  ;;  %s782_s4 = smov [#allocation9]  }
  0x4f   :  { %s513_s10 = sshll.u32 %s782_s4, 4  ;;  %s514_s10 = int_to_ptr.vmem [resolvable:$true] %s513_s10 }
  0x5e   :  { %243 = vmatmul.bf16.gmra.mxu0 %v628_v18  ;;  %263 = vmatmul.bf16.gmra.mxu2 %v632_v19 }
  0xab   :  { %v229_v24 = vpop.f32.mrf.mxu0 }
  0xac   :  { %v230_v26 = vadd.f32 %v673_v25, %v229_v24 }
  0xae   :  { %v269_v29 = vmax.f32 %v230_v26, 0.0 }
  0xb1   :  { %v249_v27 = vpop.f32.mrf.mxu2 }
  0xb2   :  { %v250_v32 = vadd.f32 %v673_v25, %v249_v27 }
  0xb3   :  { %v231_v28 = vpop.f32.mrf.mxu0 }
  0xb4   :  { %v232_v30 = vadd.f32 %v673_v25, %v231_v28  ;;  %v277_v37 = vmax.f32 %v250_v32, 0.0 }
  0xb6   :  { %v270_v31 = vmax.f32 %v232_v30, 0.0 }
  0xb8   :  { %v285_v33 = vpack.c.bf16 %v270_v31, %v269_v29 }
  0xb9   :  { %v251_v34 = vpop.f32.mrf.mxu2 }
  0xba   :  { %v252_v35 = vadd.f32 %v673_v25, %v251_v34  ;;  %381 = vmatmul.bf16.vlgmr.msra.gmra.mxu1 %v285_v33 }
  0xbb   :  { %v234_v36 = vpop.f32.mrf.mxu0 }
  0xbc   :  { %v278_v38 = vmax.f32 %v252_v35, 0.0  ;;  %v235_v40 = vadd.f32 %v673_v25, %v234_v36 }
  0xbe   :  { %v289_v39 = vpack.c.bf16 %v278_v38, %v277_v37  ;;  %v271_v43 = vmax.f32 %v235_v40, 0.0 }
  0xc0   :  { %401 = vmatmul.bf16.vlgmr.msra.gmra.mxu3 %v289_v39 }
  0xc1   :  { %v254_v41 = vpop.f32.mrf.mxu2 }
  0xc2   :  { %v255_v46 = vadd.f32 %v673_v25, %v254_v41 }
  0xc3   :  { %v236_v42 = vpop.f32.mrf.mxu0 }
  0xc4   :  { %v237_v44 = vadd.f32 %v673_v25, %v236_v42  ;;  %v279_v51 = vmax.f32 %v255_v46, 0.0 }
  0xc6   :  { %v272_v45 = vmax.f32 %v237_v44, 0.0 }
  0xc8   :  { %v286_v47 = vpack.c.bf16 %v272_v45, %v271_v43 }
  0xc9   :  { %v256_v48 = vpop.f32.mrf.mxu2 }
  0xca   :  { %v257_v49 = vadd.f32 %v673_v25, %v256_v48  ;;  %386 = vmatmul.bf16.gmra.mxu1 %v286_v47 }
  0xcb   :  { %v239_v50 = vpop.f32.mrf.mxu0 }
  0xcc   :  { %v280_v52 = vmax.f32 %v257_v49, 0.0  ;;  %v240_v54 = vadd.f32 %v673_v25, %v239_v50 }
  0xce   :  { %v290_v53 = vpack.c.bf16 %v280_v52, %v279_v51  ;;  %v273_v57 = vmax.f32 %v240_v54, 0.0 }
  0xd0   :  { %406 = vmatmul.bf16.gmra.mxu3 %v290_v53 }
  0xd1   :  { %v259_v55 = vpop.f32.mrf.mxu2 }
  0xd2   :  { %v260_v60 = vadd.f32 %v673_v25, %v259_v55 }
  0xd3   :  { %v241_v56 = vpop.f32.mrf.mxu0 }
  0xd4   :  { %v242_v58 = vadd.f32 %v673_v25, %v241_v56  ;;  %v281_v1 = vmax.f32 %v260_v60, 0.0 }
  0xd6   :  { %v274_v59 = vmax.f32 %v242_v58, 0.0 }
  0xd8   :  { %v287_v61 = vpack.c.bf16 %v274_v59, %v273_v57 }
  0xd9   :  { %v261_v62 = vpop.f32.mrf.mxu2 }
  0xda   :  { %v262_v63 = vadd.f32 %v673_v25, %v261_v62  ;;  %391 = vmatmul.bf16.gmra.mxu1 %v287_v61 }
  0xdb   :  { %v244_v0 = vpop.f32.mrf.mxu0 }
  0xdc   :  { %v282_v2 = vmax.f32 %v262_v63, 0.0  ;;  %v245_v4 = vadd.f32 %v673_v25, %v244_v0 }
  0xde   :  { %v291_v3 = vpack.c.bf16 %v282_v2, %v281_v1  ;;  %v275_v7 = vmax.f32 %v245_v4, 0.0 }
  0xe0   :  { %411 = vmatmul.bf16.gmra.mxu3 %v291_v3 }
  0xe1   :  { %v264_v5 = vpop.f32.mrf.mxu2 }
  0xe2   :  { %v265_v10 = vadd.f32 %v673_v25, %v264_v5 }
  0xe3   :  { %v246_v6 = vpop.f32.mrf.mxu0 }
  0xe4   :  { %v247_v8 = vadd.f32 %v673_v25, %v246_v6  ;;  %v283_v14 = vmax.f32 %v265_v10, 0.0 }
  0xe6   :  { %v276_v9 = vmax.f32 %v247_v8, 0.0 }
  0xe8   :  { %v288_v11 = vpack.c.bf16 %v276_v9, %v275_v7 }
  0xe9   :  { %v266_v12 = vpop.f32.mrf.mxu2 }
  0xea   :  { %v267_v13 = vadd.f32 %v673_v25, %v266_v12  ;;  %396 = vmatmul.bf16.gmra.mxu1 %v288_v11 }
  0xec   :  { %v284_v15 = vmax.f32 %v267_v13, 0.0 }
  0xee   :  { %v292_v16 = vpack.c.bf16 %v284_v15, %v283_v14 }
  0xf0   :  { %416 = vmatmul.bf16.gmra.mxu3 %v292_v16 }
 0x137   :  { %v382_v18 = vpop.f32.mrf.mxu1 }
 0x138   :  { %v477_v19 = vadd.f32 %v674_v17, %v382_v18 }
 0x13a   :  { %493 = vst [vmem:[#allocation9] sm:$0xff] %v477_v19 }
 0x13f   :  { %v384_v20 = vpop.f32.mrf.mxu1 }
 0x140   :  { %v478_v21 = vadd.f32 %v674_v17, %v384_v20 }
 0x142   :  { %494 = vst [vmem:[#allocation9 + $0x8] sm:$0xff] %v478_v21 }
 0x143   :  { %v402_v22 = vpop.f32.mrf.mxu3 }
 0x144   :  { %v485_v23 = vadd.f32 %v674_v17, %v402_v22 }
 0x146   :  { %501 = vst [vmem:[#allocation9 + $0x40] sm:$0xff] %v485_v23 }
 0x147   :  { %v387_v24 = vpop.f32.mrf.mxu1 }
 0x148   :  { %v479_v25 = vadd.f32 %v674_v17, %v387_v24 }
 0x14a   :  { %495 = vst [vmem:[#allocation9 + $0x10] sm:$0xff] %v479_v25 }
 0x14b   :  { %v404_v26 = vpop.f32.mrf.mxu3 }
 0x14c   :  { %v486_v27 = vadd.f32 %v674_v17, %v404_v26 }
 0x14e   :  { %502 = vst [vmem:[#allocation9 + $0x48] sm:$0xff] %v486_v27 }
 0x14f   :  { %v389_v28 = vpop.f32.mrf.mxu1 }
 0x150   :  { %v480_v29 = vadd.f32 %v674_v17, %v389_v28 }
 0x152   :  { %496 = vst [vmem:[#allocation9 + $0x18] sm:$0xff] %v480_v29 }
 0x153   :  { %v407_v30 = vpop.f32.mrf.mxu3 }
 0x154   :  { %v487_v31 = vadd.f32 %v674_v17, %v407_v30 }
 0x156   :  { %503 = vst [vmem:[#allocation9 + $0x50] sm:$0xff] %v487_v31 }
 0x157   :  { %v392_v32 = vpop.f32.mrf.mxu1 }
 0x158   :  { %v481_v33 = vadd.f32 %v674_v17, %v392_v32 }
 0x15a   :  { %497 = vst [vmem:[#allocation9 + $0x20] sm:$0xff] %v481_v33 }
 0x15b   :  { %v409_v34 = vpop.f32.mrf.mxu3 }
 0x15c   :  { %v488_v35 = vadd.f32 %v674_v17, %v409_v34 }
 0x15e   :  { %504 = vst [vmem:[#allocation9 + $0x58] sm:$0xff] %v488_v35 }
 0x15f   :  { %v394_v36 = vpop.f32.mrf.mxu1 }
 0x160   :  { %v482_v37 = vadd.f32 %v674_v17, %v394_v36 }
 0x162   :  { %498 = vst [vmem:[#allocation9 + $0x28] sm:$0xff] %v482_v37 }
 0x163   :  { %v412_v38 = vpop.f32.mrf.mxu3 }
 0x164   :  { %v489_v39 = vadd.f32 %v674_v17, %v412_v38 }
 0x166   :  { %505 = vst [vmem:[#allocation9 + $0x60] sm:$0xff] %v489_v39 }
 0x167   :  { %v397_v40 = vpop.f32.mrf.mxu1 }
 0x168   :  { %v483_v41 = vadd.f32 %v674_v17, %v397_v40 }
 0x16a   :  { %499 = vst [vmem:[#allocation9 + $0x30] sm:$0xff] %v483_v41 }
 0x16b   :  { %v414_v42 = vpop.f32.mrf.mxu3 }
 0x16c   :  { %v490_v43 = vadd.f32 %v674_v17, %v414_v42 }
 0x16e   :  { %506 = vst [vmem:[#allocation9 + $0x68] sm:$0xff] %v490_v43 }
 0x16f   :  { %v399_v44 = vpop.f32.mrf.mxu1 }
 0x170   :  { %v484_v45 = vadd.f32 %v674_v17, %v399_v44 }
 0x172   :  { %500 = vst [vmem:[#allocation9 + $0x38] sm:$0xff] %v484_v45 }
 0x173   :  { %v417_v46 = vpop.f32.mrf.mxu3 }
 0x174   :  { %v491_v47 = vadd.f32 %v674_v17, %v417_v46 }
 0x176   :  { %507 = vst [vmem:[#allocation9 + $0x70] sm:$0xff] %v491_v47 }
 0x17b   :  { %v419_v48 = vpop.f32.mrf.mxu3 }
 0x17c   :  { %v492_v49 = vadd.f32 %v674_v17, %v419_v48 }
 0x17e   :  { %508 = vst [vmem:[#allocation9 + $0x78] sm:$0xff] %v492_v49 }
 0x17f   :  { %521 = dma.vmem_to_hbm [thread:$0]  %s514_s10, 2048, %s516_s13, [#allocation5], %s783_s14, %s783_s14, %s784_s15  }
 0x180   :  { %775 = dma.done.wait [#allocation5], 2048  }
 0x181   :  { %776 = vsyncadd [#allocation5], 4294965248 }
 0x182   :  { %526 = vsyncpa [#allocation4], 1 }
 0x183   :  { %527 = vsyncpa [#allocation7], 1 }
 0x184   :  { %528 = vsyncpa [#allocation5], 1 }

</bundles_post_ra>
